<compile_context>
chip_gen: v6e
topology: v6e:2x2x1
jax: 0.10.0
libtpu: 0.0.40
codegen_flags: <defaults>
</compile_context>

<pallas_src>
import functools
import math
from types import SimpleNamespace

import jax
import jax.numpy as jnp
from jax.experimental import pallas as pl
from jax.experimental.pallas import tpu as pltpu

_VMEM_LIMIT = 64 * 1024 * 1024


def _cparams():
    return pltpu.CompilerParams(dimension_semantics=("parallel",),
                                vmem_limit_bytes=_VMEM_LIMIT)


def _layernorm(x, g, b, eps):
    mu = jnp.mean(x, axis=-1, keepdims=True)
    xc = x - mu
    var = jnp.mean(xc * xc, axis=-1, keepdims=True)
    return (xc * jax.lax.rsqrt(var + eps)) * g + b


# ---------------------------------------------------------------------------
# Pallas kernels
# ---------------------------------------------------------------------------

def _q_norm_proj_kernel(h_ref, g_ref, b_ref, wq_ref, q_ref, *, eps):
    # LN1(h) @ Wq  (bias-free projection, no dummy bias DMA)
    xn = _layernorm(h_ref[0], g_ref[...], b_ref[...], eps)               # (M, H)
    q_ref[0] = jnp.dot(xn, wq_ref[...], preferred_element_type=jnp.float32)


def _mem_kv_span_kernel(hm_ref, cmem_ref, g_ref, b_ref, wk_ref, wv_ref,
                        sw_ref, sb_ref, k_ref, v_ref, span_ref,
                        *, eps, size, pre_div):
    # LN1(h_memory), K/V projections and the span-predictor contraction on hm_n
    # directly (no (B,H,L) transpose, no extra pass over the memory hiddens).
    hm_n = _layernorm(hm_ref[0], g_ref[...], b_ref[...], eps)            # (L, H)
    k_ref[0] = jnp.dot(hm_n, wk_ref[...], preferred_element_type=jnp.float32)
    v_ref[0] = jnp.dot(hm_n, wv_ref[...], preferred_element_type=jnp.float32)
    logit = jnp.dot(hm_n * (1.0 / pre_div), sw_ref[...],
                    preferred_element_type=jnp.float32) + sb_ref[...]    # (L, 1)
    max_span = jax.nn.sigmoid(logit) * size                              # (L, 1)
    span_ref[0] = max_span - cmem_ref[0]                                 # remaining_offset


def _attention_kernel(q_ref, k_ref, v_ref, pos_ref, span_ref, o_ref, loss_ref,
                      *, scale, ramp, loss_coef):
    q = q_ref[0]                                                          # (K, M, Dh)
    k = k_ref[0]                                                          # (K, L, Dh)
    v = v_ref[0]                                                          # (K, L, Dh)
    pos = pos_ref[0]                                                      # (K, M, L)
    spans = span_ref[0]                                                   # (1, L)
    K, M, Dh = q.shape
    L = k.shape[1]

    # --- expire-span soft mask, causal mask and aux loss (once per batch, all heads) ---
    rows_f = jax.lax.broadcasted_iota(jnp.float32, (M, L), 0)
    rem_span = spans - rows_f                                             # (M, L)
    em = jnp.clip(rem_span * (1.0 / ramp) + 1.0, 0.0, 1.0)
    ramp_on = jnp.logical_and(em > 0.0, em < 1.0)
    loss_ref[0] = jnp.sum(jnp.where(ramp_on, rem_span, 0.0)) * (loss_coef / (ramp * M))
    rows_i = jax.lax.broadcasted_iota(jnp.int32, (M, L), 0)
    cols_i = jax.lax.broadcasted_iota(jnp.int32, (M, L), 1)
    causal = (cols_i <= rows_i + (L - M - 1)).astype(jnp.float32)
    mask = em * causal                                                    # (M, L)

    # --- scores: batched MXU matmul over heads + relative-position bias ---
    s = jnp.einsum("kmd,knd->kmn", q, k, preferred_element_type=jnp.float32)
    s = s + pos
    # large-negative fill instead of -inf: fully-expired rows give 0 output, never NaN.
    s = jnp.where(mask[None] == 0.0, jnp.float32(-1e30), s)
    s = s * scale                                                         # / sqrt(head_dim)
    m = jnp.max(s, axis=-1, keepdims=True)
    p = jnp.exp(s - m) * mask[None]                                       # soft expire mask
    denom = jnp.sum(p, axis=-1, keepdims=True) + 1e-8
    p = p * pl.reciprocal(denom, approx=True)                             # single renormalize (EUP)
    o_ref[0] = jnp.einsum("kmn,knd->kmd", p, v,
                          preferred_element_type=jnp.float32).astype(o_ref.dtype)


def _out_ffn_kernel(a_ref, h_ref, wo_ref, g_ref, b_ref, w1_ref, b1_ref,
                    w2_ref, b2_ref, o_ref, *, eps):
    # proj_out + residual + LN2 + FC1/ReLU + FC2 + residual, all in VMEM.
    attn_out = jnp.dot(a_ref[...], wo_ref[...], preferred_element_type=jnp.float32)
    h2 = h_ref[...] + attn_out
    x = _layernorm(h2, g_ref[...], b_ref[...], eps)
    f = jnp.maximum(jnp.dot(x, w1_ref[...], preferred_element_type=jnp.float32)
                    + b1_ref[...], 0.0)
    f2 = jnp.dot(f, w2_ref[...], preferred_element_type=jnp.float32) + b2_ref[...]
    o_ref[...] = (h2 + f2).astype(o_ref.dtype)


# ---------------------------------------------------------------------------
# pallas_call wrappers
# ---------------------------------------------------------------------------

def q_norm_proj(h, g, b, wq, eps=1e-5):
    B, M, H = h.shape
    KD = wq.shape[1]
    return pl.pallas_call(
        functools.partial(_q_norm_proj_kernel, eps=eps),
        out_shape=jax.ShapeDtypeStruct((B, M, KD), jnp.float32),
        grid=(B,),
        in_specs=[pl.BlockSpec((1, M, H), lambda i: (i, 0, 0)),
                  pl.BlockSpec((1, H), lambda i: (0, 0)),
                  pl.BlockSpec((1, H), lambda i: (0, 0)),
                  pl.BlockSpec((H, KD), lambda i: (0, 0))],
        out_specs=pl.BlockSpec((1, M, KD), lambda i: (i, 0, 0)),
        compiler_params=_cparams(),
    )(h, g, b, wq)


def mem_kv_span(hm, cmem, g, b, wk, wv, sw, sb, *, size, pre_div, eps=1e-5):
    B, L, H = hm.shape
    KD = wk.shape[1]
    return pl.pallas_call(
        functools.partial(_mem_kv_span_kernel, eps=eps, size=size, pre_div=pre_div),
        out_shape=(jax.ShapeDtypeStruct((B, L, KD), jnp.float32),
                   jax.ShapeDtypeStruct((B, L, KD), jnp.float32),
                   jax.ShapeDtypeStruct((B, L, 1), jnp.float32)),
        grid=(B,),
        in_specs=[pl.BlockSpec((1, L, H), lambda i: (i, 0, 0)),
                  pl.BlockSpec((1, L, 1), lambda i: (i, 0, 0)),
                  pl.BlockSpec((1, H), lambda i: (0, 0)),
                  pl.BlockSpec((1, H), lambda i: (0, 0)),
                  pl.BlockSpec((H, KD), lambda i: (0, 0)),
                  pl.BlockSpec((H, KD), lambda i: (0, 0)),
                  pl.BlockSpec((H, 1), lambda i: (0, 0)),
                  pl.BlockSpec((1, 1), lambda i: (0, 0))],
        out_specs=(pl.BlockSpec((1, L, KD), lambda i: (i, 0, 0)),
                   pl.BlockSpec((1, L, KD), lambda i: (i, 0, 0)),
                   pl.BlockSpec((1, L, 1), lambda i: (i, 0, 0))),
        compiler_params=_cparams(),
    )(hm, cmem, g, b, wk, wv, sw, sb)


def fused_attention(q, k, v, pos, spans, *, head_dim, ramp, loss_coef):
    B, K, M, Dh = q.shape
    L = k.shape[2]
    return pl.pallas_call(
        functools.partial(_attention_kernel, scale=1.0 / math.sqrt(head_dim),
                          ramp=ramp, loss_coef=loss_coef),
        out_shape=(jax.ShapeDtypeStruct((B, K, M, Dh), jnp.float32),
                   jax.ShapeDtypeStruct((B,), jnp.float32)),
        grid=(B,),
        in_specs=[pl.BlockSpec((1, K, M, Dh), lambda i: (i, 0, 0, 0)),
                  pl.BlockSpec((1, K, L, Dh), lambda i: (i, 0, 0, 0)),
                  pl.BlockSpec((1, K, L, Dh), lambda i: (i, 0, 0, 0)),
                  pl.BlockSpec((1, K, M, L), lambda i: (i, 0, 0, 0)),
                  pl.BlockSpec((1, 1, L), lambda i: (i, 0, 0))],
        out_specs=(pl.BlockSpec((1, K, M, Dh), lambda i: (i, 0, 0, 0)),
                   pl.BlockSpec((1,), lambda i: (i,),
                                memory_space=pltpu.MemorySpace.SMEM)),
        compiler_params=_cparams(),
    )(q, k, v, pos, spans)


def out_proj_ffn(a, h, wo, g, b, w1, b1, w2, b2, eps=1e-5):
    N, KD = a.shape
    H = h.shape[1]
    I = w1.shape[1]
    tile = 256 if N % 256 == 0 else N          # row-tiled at production sizes
    return pl.pallas_call(
        functools.partial(_out_ffn_kernel, eps=eps),
        out_shape=jax.ShapeDtypeStruct((N, H), jnp.float32),
        grid=(N // tile,),
        in_specs=[pl.BlockSpec((tile, KD), lambda i: (i, 0)),
                  pl.BlockSpec((tile, H), lambda i: (i, 0)),
                  pl.BlockSpec((KD, H), lambda i: (0, 0)),
                  pl.BlockSpec((1, H), lambda i: (0, 0)),
                  pl.BlockSpec((1, H), lambda i: (0, 0)),
                  pl.BlockSpec((H, I), lambda i: (0, 0)),
                  pl.BlockSpec((1, I), lambda i: (0, 0)),
                  pl.BlockSpec((I, H), lambda i: (0, 0)),
                  pl.BlockSpec((1, H), lambda i: (0, 0))],
        out_specs=pl.BlockSpec((tile, H), lambda i: (i, 0)),
        compiler_params=_cparams(),
    )(a, h, wo, g, b, w1, b1, w2, b2)


# ---------------------------------------------------------------------------
# Parameters & forward glue
# ---------------------------------------------------------------------------

def _skew(x):
    # x: (B, K, M, P) -> (B, K, M, P+M); out[..., m, m+p] = x[..., m, p], zeros elsewhere.
    # Exact JAX port of the torch `skew` pad/reshape trick (cheap XLA metadata glue).
    B, K, M, P = x.shape
    x = jnp.pad(x, ((0, 0), (0, 0), (0, 0), (0, M + 1)))
    x = x.reshape(B, K, M * (P + M + 1))[:, :, :M * (P + M)]
    return x.reshape(B, K, M, P + M)


def init_params(key, args):
    H, K, Dh, I = args.hid_sz, args.nheads, args.head_dim, args.inner_hid_sz
    Mpe = min(args.attn_lim, args.mem_sz)
    ks = jax.random.split(key, 8)

    def rnd(k, shape, scale):
        return scale * jax.random.normal(k, shape, jnp.float32)

    b_init = -math.log(1.0 / args.expire_span_init_percentage - 1.0)
    return {
        "ln1_g": jnp.ones((1, H), jnp.float32), "ln1_b": jnp.zeros((1, H), jnp.float32),
        "ln2_g": jnp.ones((1, H), jnp.float32), "ln2_b": jnp.zeros((1, H), jnp.float32),
        "Wq": rnd(ks[0], (H, K * Dh), 0.08),
        "Wk": rnd(ks[1], (H, K * Dh), 0.08),
        "Wv": rnd(ks[2], (H, K * Dh), 0.08),
        "Wo": rnd(ks[3], (K * Dh, H), 0.08),
        "key_pe": rnd(ks[4], (1, Dh, Mpe), 0.1),
        "span_w": rnd(ks[5], (H, 1), 0.01),                 # span_predictor weight (column)
        "span_b": jnp.full((1, 1), b_init, jnp.float32),    # span_predictor bias
        "W1": rnd(ks[6], (H, I), 0.08), "b1": jnp.zeros((1, I), jnp.float32),
        "W2": rnd(ks[7], (I, H), 0.08), "b2": jnp.zeros((1, H), jnp.float32),
    }


def transformer_seq_layer(h, h_memory, c_memory, params, args):
    B, M, H = h.shape
    L = h_memory.shape[1]
    K, Dh = args.nheads, args.head_dim
    KD = K * Dh
    assert args.attn_lim >= args.mem_sz and L >= 2 * M

    # pre_norm branch: LN1 + projections (fused kernels, no dummy biases)
    q_flat = q_norm_proj(h, params["ln1_g"], params["ln1_b"], params["Wq"])
    k_flat, v_flat, spans_col = mem_kv_span(
        h_memory, c_memory.reshape(B, L, 1).astype(jnp.float32),
        params["ln1_g"], params["ln1_b"], params["Wk"], params["Wv"],
        params["span_w"], params["span_b"],
        size=float(args.attn_lim), pre_div=float(args.expire_span_pre_div))

    q_heads = q_flat.reshape(B, M, K, Dh).transpose(0, 2, 1, 3)       # (B, K, M, Dh)
    k_heads = k_flat.reshape(B, L, K, Dh).transpose(0, 2, 1, 3)       # (B, K, L, Dh)
    v_heads = v_flat.reshape(B, L, K, Dh).transpose(0, 2, 1, 3)       # (B, K, L, Dh)
    spans = spans_col.reshape(B, L)                                   # remaining_offset

    # relative-position bias: MXU matmul q @ key_pe, skewed and left-padded to width L
    # (replaces the old per-channel VPU loop and the (Dh, M, L) pre-skewed tensor).
    pe = params["key_pe"][0]                                          # (Dh, Mpe), Mpe == M
    assert pe.shape[1] == M
    ap = jnp.einsum("bkmd,dp->bkmp", q_heads, pe)                     # (B, K, M, M)
    pos = jnp.pad(_skew(ap), ((0, 0), (0, 0), (0, 0), (L - 2 * M, 0)))  # (B, K, M, L)
    # TODO(synk): do the skew in-kernel with pltpu.roll(stride=1) once L is lane-aligned,
    # so only the tiny (Dh, M) key_pe table crosses HBM.

    # attention over all heads per batch step; expire/causal mask + aux loss built in-kernel
    out_h, aux_loss = fused_attention(
        q_heads, k_heads, v_heads, pos, spans.reshape(B, 1, L),
        head_dim=Dh, ramp=float(args.expire_span_ramp),
        loss_coef=float(args.expire_span_loss))

    # output projection + residual + LN2 + FFN + residual (single fused kernel)
    a_merged = out_h.transpose(0, 2, 1, 3).reshape(B * M, KD)
    out = out_proj_ffn(a_merged, h.reshape(B * M, H), params["Wo"],
                       params["ln2_g"], params["ln2_b"],
                       params["W1"], params["b1"], params["W2"], params["b2"])
    return out.reshape(B, M, H), aux_loss, spans


if __name__ == "__main__":
    args = SimpleNamespace(
        hid_sz=32, nheads=4, head_dim=8, inner_hid_sz=64, nlayers=2,
        mem_sz=8, attn_lim=16, dropout=0.0, pre_norm=True,
        expire_span=True, expire_span_ramp=8, expire_span_loss=1e-3,
        expire_span_pre_div=4.0, expire_span_init_percentage=0.1,
        expire_span_noisy=False)

    B, M, H = 2, args.mem_sz, args.hid_sz
    L = 24   # memory length (2*M <= L <= attn_lim + mem_sz + ramp)

    root = jax.random.PRNGKey(0)
    kp, kh, km, kc = jax.random.split(root, 4)
    params = init_params(kp, args)
    h = jax.random.normal(kh, (B, M, H), jnp.float32)
    h_memory = jax.random.normal(km, (B, L, H), jnp.float32)
    c_memory = jax.random.uniform(kc, (B, L), jnp.float32, 0.0, 1.0)

    out, aux_loss, spans = transformer_seq_layer(h, h_memory, c_memory, params, args)
    out, aux_loss, spans = jax.block_until_ready((out, aux_loss, spans))

    assert out.shape == (B, M, H)
    assert aux_loss.shape == (B,)
    assert spans.shape == (B, L)
    assert bool(jnp.isfinite(out).all()) and bool(jnp.isfinite(aux_loss).all())
    assert bool(jnp.isfinite(spans).all())
    print("KERNEL_OK")
</pallas_src>

<mosaic_0001>
module attributes {stable_mosaic.version = 11 : i64} {
  func.func @_q_norm_proj_kernel(%arg0: i32, %arg1: memref<1x8x32xf32, #tpu.memory_space<vmem>>, %arg2: memref<1x32xf32, #tpu.memory_space<vmem>>, %arg3: memref<1x32xf32, #tpu.memory_space<vmem>>, %arg4: memref<32x32xf32, #tpu.memory_space<vmem>>, %arg5: memref<1x8x32xf32, #tpu.memory_space<vmem>>) attributes {dimension_semantics = [#tpu.dimension_semantics<parallel>], iteration_bounds = array<i64: 2>, scalar_prefetch = 0 : i64, scratch_operands = 0 : i64, tpu.core_type = #tpu.core_type<tc>, window_params = [{transform_indices = @transform_0, window_bounds = array<i64: 1, 8, 32>}, {pipeline_mode = #tpu.pipeline_mode<synchronous>, transform_indices = @transform_1, window_bounds = array<i64: 1, 32>}, {pipeline_mode = #tpu.pipeline_mode<synchronous>, transform_indices = @transform_2, window_bounds = array<i64: 1, 32>}, {pipeline_mode = #tpu.pipeline_mode<synchronous>, transform_indices = @transform_3, window_bounds = array<i64: 32, 32>}, {transform_indices = @transform_4, window_bounds = array<i64: 1, 8, 32>}]} {
    %c0 = arith.constant 0 : index
    %c0_0 = arith.constant 0 : index
    %c0_1 = arith.constant 0 : index
    %0 = vector.load %arg1[%c0, %c0_0, %c0_1] : memref<1x8x32xf32, #tpu.memory_space<vmem>>, vector<1x8x32xf32>
    %1 = vector.shape_cast %0 : vector<1x8x32xf32> to vector<8x32xf32>
    %c0_2 = arith.constant 0 : index
    %c0_3 = arith.constant 0 : index
    %2 = vector.load %arg2[%c0_2, %c0_3] : memref<1x32xf32, #tpu.memory_space<vmem>>, vector<1x32xf32>
    %c0_4 = arith.constant 0 : index
    %c0_5 = arith.constant 0 : index
    %3 = vector.load %arg3[%c0_4, %c0_5] : memref<1x32xf32, #tpu.memory_space<vmem>>, vector<1x32xf32>
    %cst = arith.constant dense<0.000000e+00> : vector<8xf32>
    %4 = vector.multi_reduction <add>, %1, %cst [1] : vector<8x32xf32> to vector<8xf32>
    %5 = vector.shape_cast %4 : vector<8xf32> to vector<8x1xf32>
    %cst_6 = arith.constant 3.200000e+01 : f32
    %6 = vector.broadcast %cst_6 : f32 to vector<8x1xf32>
    %7 = arith.divf %5, %6 : vector<8x1xf32>
    %8 = vector.broadcast %7 : vector<8x1xf32> to vector<8x32xf32>
    %9 = arith.subf %1, %8 : vector<8x32xf32>
    %10 = arith.mulf %9, %9 : vector<8x32xf32>
    %cst_7 = arith.constant dense<0.000000e+00> : vector<8xf32>
    %11 = vector.multi_reduction <add>, %10, %cst_7 [1] : vector<8x32xf32> to vector<8xf32>
    %12 = vector.shape_cast %11 : vector<8xf32> to vector<8x1xf32>
    %cst_8 = arith.constant 3.200000e+01 : f32
    %13 = vector.broadcast %cst_8 : f32 to vector<8x1xf32>
    %14 = arith.divf %12, %13 : vector<8x1xf32>
    %cst_9 = arith.constant 9.99999974E-6 : f32
    %15 = vector.broadcast %cst_9 : f32 to vector<8x1xf32>
    %16 = arith.addf %14, %15 : vector<8x1xf32>
    %17 = math.rsqrt %16 : vector<8x1xf32>
    %18 = vector.broadcast %17 : vector<8x1xf32> to vector<8x32xf32>
    %19 = arith.mulf %9, %18 : vector<8x32xf32>
    %20 = vector.broadcast %2 : vector<1x32xf32> to vector<8x32xf32>
    %21 = arith.mulf %19, %20 : vector<8x32xf32>
    %22 = vector.broadcast %3 : vector<1x32xf32> to vector<8x32xf32>
    %23 = arith.addf %21, %22 : vector<8x32xf32>
    %c0_10 = arith.constant 0 : index
    %c0_11 = arith.constant 0 : index
    %24 = vector.load %arg4[%c0_10, %c0_11] : memref<32x32xf32, #tpu.memory_space<vmem>>, vector<32x32xf32>
    %cst_12 = arith.constant dense<0.000000e+00> : vector<8x32xf32>
    %25 = tpu.matmul %23, %24, %cst_12 {dimension_numbers = #tpu.dot_dimension_numbers<[1], [0], [0], [1], [0, 0, 1, 1], [], []>} : vector<8x32xf32>, vector<32x32xf32>, vector<8x32xf32> -> vector<8x32xf32>
    %c0_13 = arith.constant 0 : index
    %c0_14 = arith.constant 0 : index
    %c0_15 = arith.constant 0 : index
    %26 = vector.load %arg5[%c0_13, %c0_14, %c0_15] : memref<1x8x32xf32, #tpu.memory_space<vmem>>, vector<1x8x32xf32>
    %27 = vector.shape_cast %26 : vector<1x8x32xf32> to vector<8x32xf32>
    %28 = vector.shape_cast %25 : vector<8x32xf32> to vector<1x8x32xf32>
    tpu.vector_store %arg5[%c0_13, %c0_14, %c0_15], %28 {strides = array<i32>} : memref<1x8x32xf32, #tpu.memory_space<vmem>>, vector<1x8x32xf32>,
    return
  }
  func.func @transform_0(%arg0: i32) -> (i32, i32, i32) {
    %c0_i32 = arith.constant 0 : i32
    %c0_i32_0 = arith.constant 0 : i32
    %c0_i32_1 = arith.constant 0 : i32
    return %arg0, %c0_i32, %c0_i32_0 : i32, i32, i32
  }
  func.func @transform_1(%arg0: i32) -> (i32, i32) {
    %c0_i32 = arith.constant 0 : i32
    %c0_i32_0 = arith.constant 0 : i32
    %c0_i32_1 = arith.constant 0 : i32
    return %c0_i32, %c0_i32_0 : i32, i32
  }
  func.func @transform_2(%arg0: i32) -> (i32, i32) {
    %c0_i32 = arith.constant 0 : i32
    %c0_i32_0 = arith.constant 0 : i32
    %c0_i32_1 = arith.constant 0 : i32
    return %c0_i32, %c0_i32_0 : i32, i32
  }
  func.func @transform_3(%arg0: i32) -> (i32, i32) {
    %c0_i32 = arith.constant 0 : i32
    %c0_i32_0 = arith.constant 0 : i32
    %c0_i32_1 = arith.constant 0 : i32
    return %c0_i32, %c0_i32_0 : i32, i32
  }
  func.func @transform_4(%arg0: i32) -> (i32, i32, i32) {
    %c0_i32 = arith.constant 0 : i32
    %c0_i32_0 = arith.constant 0 : i32
    %c0_i32_1 = arith.constant 0 : i32
    return %arg0, %c0_i32, %c0_i32_0 : i32, i32, i32
  }
}

</mosaic_0001>

<bundles_post_ra>
// kernel: tpu_custom_call.1
= control target key start
LH: loop header
LB: loop body
LE: loop exit
PB: predicated region body
PF: predicated region fallthrough
CT: control target
= control target key end

     0   :  { %9 = vsyncpa [#allocation3], 0  ;;  %s864_s0 = inlined_call_operand.hbm [shape: f32[2,8,32], index: 0, kind: input, shape index: {}]   ;;  %s865_s1 = inlined_call_operand.vmem [shape: f32[1,32], index: 1, kind: input, shape index: {}]   ;;  %s866_s2 = inlined_call_operand.vmem [shape: f32[1,32], index: 2, kind: input, shape index: {}]   ;;  %s867_s3 = inlined_call_operand.hbm [shape: f32[32,32], index: 3, kind: input, shape index: {}]   ;;  %s868_s4 = inlined_call_operand.hbm [shape: f32[2,8,32], index: 4, kind: output, shape index: {}]  }
   0x1   :  { %11 = vsyncpa [#allocation3 + $0x1], 0 }
   0x2   :  { %12 = vsyncpa [#allocation6], 0 }
   0x3   :  { %13 = vsyncpa [#allocation4], 0 }
   0x4   :  { %15 = vsyncpa [#allocation4 + $0x1], 0  ;;  %s684_s15 = smov 0   ;;  %s686_s16 = smov 0  }
   0x5   :  { %s688_s17 = smov 0   ;;  %s690_s18 = smov 0  }
   0x6 LB: > { %s705_s19 = sadd.s32 4294967295, %s650_s18   ;;  %s432_s20 = sadd.s32 4294967294, %s650_s18   ;;  %s650_s18 = sphi %s690_s18, %s890_s18   ;;  %s646_s17 = sphi %s688_s17, %s889_s17   ;;  %s642_s16 = sphi %s686_s16, %s888_s16   ;;  %s638_s15 = sphi %s684_s15, %s887_s15  }
   0x7   : > { %p41_p0 = scmp.ne.s32.totalorder %s642_s16, %s638_s15  ;;  %p869_p1 = scmp.eq.s32.totalorder %s705_s19, 0 }
   0x8   : > { %p134_p3 = scmp.eq.s32.totalorder %s432_s20, 1  ;;  %p433_p5 = scmp.ge.s32.totalorder %s650_s18, 1 }
   0x9   : > { %p714_p4 = por %p869_p1, %p41_p0  ;;  %p141_p7 = scmp.lt.s32.totalorder %s650_s18, 3 }
   0xa   : > { %p719_p6 = por %p134_p3, %p41_p0  ;;  %s652_s24 = smov [#allocation5]  }
   0xb   : > { %s873_s21 = scalar_select %p714_p4, 1, 0 }
   0xc   : > { %s874_s22 = scalar_select %p719_p6, 1, 0 }
   0xd   : > { %p724_p8 = pnand %p433_p5, %p141_p7  ;;  %s159_s25 = sshll.u32 %s652_s24, 4  ;;  %s160_s25 = int_to_ptr.vmem [resolvable:$true] %s159_s25 }
   0xe   : > { %s738_s27 = sadd.s32 1, %s650_s18   ;;  %s28_s28 = sadd.s32 1, %s646_s17 }
   0xf   : > { %s875_s23 = scalar_select %p724_p8, 1, 0 }
  0x10   : > { %p473_p9 = pneg %p724_p8  ;;  %s25_s29 = ssub.s32 %s650_s18, %s738_s27 }
  0x11   : > { %s539_s30 = scalar_lea.vmem %s160_s25, 512  ;;  %p547_p5 = scmp.lt.s32.totalorder %s160_s25, %s160_s25 }
  0x12   : > { %p733_p11 = pnand %p473_p9, %p869_p1  ;;  %p540_p13 = scmp.ne.s32.totalorder %s160_s25, %s539_s30 }
  0x13   : > { %p548_p7 = scmp.lt.s32.totalorder %s539_s30, %s539_s30 }
  0x14   : > { %p530_p12 = pneg %p733_p11 }
  0x15   : > { %p549_p10 = por %p548_p7, %p547_p5 }
  0x16   : > { %p542_p0 = pnand %p540_p13, %p530_p12 }
  0x18   : > { %p543_p3 = pneg %p542_p0 }
  0x1a   : > { %p550_p2 = pnand %p549_p10, %p543_p3 }
  0x1c   : > { %553 = shalt.err (!%p550_p2)
}
  0x1d   : > { %s653_s5 = smov 128   ;;  %s654_s6 = smov 8  }
  0x1e   : > { %476 = dma.hbm_to_vmem [thread:$0]  (!%p733_p11), %s867_s3, 512, %s160_s25, [#allocation6], %s653_s5, %s653_s5, %s654_s6  }
  0x1f   : > { %p26_p9 = scmp.eq.s32.totalorder %s25_s29, 0  ;;  %p35_p12 = scmp.ne.s32.totalorder %s646_s17, %s642_s16 }
  0x20   : > { %p36_p10 = scmp.eq.s32.totalorder %s650_s18, 0  ;;  %p486_p2 = scmp.lt.s32.totalorder %s650_s18, 2 }
  0x21   : > { %s755_s9 = scalar_select %p26_p9, %s646_s17, %s28_s28  }
  0x22   : > { %p37_p13 = por %p36_p10, %p35_p12  ;;  %p877_p0 = scmp.eq.s32.totalorder %s705_s19, 1 }
  0x23   : > { %s173_s11 = sand.u32 1, %s646_s17   ;;  %s437_s12 = sshll.u32 %s650_s18, 7 }
  0x24   : > { %p759_p3 = por %p877_p0, %p35_p12  ;;  %s436_s13 = sshll.u32 %s173_s11, 3 }
  0x25   : > { %s768_s24 = scalar_lea.hbm %s864_s0, %s437_s12  ;;  %s177_s25 = scalar_lea.vmem [#allocation2], %s436_s13 }
  0x26   : > { %s878_s10 = scalar_select %p759_p3, 1, 0 }
  0x27   : > { %s184_s26 = sshll.u32 %s177_s25, 4  ;;  %p770_p11 = pnand %p486_p2, %p37_p13  ;;  %s185_s26 = int_to_ptr.vmem [resolvable:$true] %s184_s26 }
  0x28   : > { %s174_s29 = scalar_lea.sflag [#allocation3], %s173_s11  ;;  %s554_s30 = scalar_lea.hbm %s768_s24, 128 }
  0x29   : > { %p555_p5 = scmp.ne.s32.totalorder %s768_s24, %s554_s30  ;;  %p556_p7 = pneg %p770_p11 }
  0x2a   : > { %s559_s7 = scalar_lea.hbm %s864_s0, 256  ;;  %p560_p10 = scmp.lt.s32.totalorder %s768_s24, %s864_s0 }
  0x2b   : > { %p557_p9 = pnand %p556_p7, %p555_p5  ;;  %p561_p2 = scmp.lt.s32.totalorder %s559_s7, %s554_s30 }
  0x2d   : > { %p558_p12 = pneg %p557_p9  ;;  %p562_p13 = por %p561_p2, %p560_p10 }
  0x2f   : > { %p563_p0 = pnand %p562_p13, %p558_p12 }
  0x31   : > { %566 = shalt.err (!%p563_p0)
}
  0x32   : > { %s567_s13 = scalar_lea.vmem %s185_s26, 128  ;;  %s655_s11 = smov [#allocation2]  }
  0x33   : > { %p568_p1 = scmp.ne.s32.totalorder %s185_s26, %s567_s13  ;;  %s572_s14 = sshll.u32 %s655_s11, 4  ;;  %s573_s14 = int_to_ptr.vmem [resolvable:$false] %s572_s14 }
  0x34   : > { %s574_s20 = scalar_lea.vmem %s573_s14, 256  ;;  %p575_p5 = scmp.lt.s32.totalorder %s185_s26, %s573_s14 }
  0x35   : > { %p570_p6 = pnand %p568_p1, %p556_p7  ;;  %p576_p9 = scmp.lt.s32.totalorder %s574_s20, %s567_s13 }
  0x37   : > { %p571_p3 = pneg %p570_p6  ;;  %p577_p4 = por %p576_p9, %p575_p5 }
  0x39   : > { %p578_p8 = pnand %p577_p4, %p571_p3 }
  0x3b   : > { %581 = shalt.err (!%p578_p8)
}
  0x3c   : > { %480 = dma.hbm_to_vmem [thread:$0]  (!%p770_p11), %s768_s24, 128, %s185_s26, %s174_s29  }
  0x3d   : > { %p880_p12 = scmp.ne.s32.totalorder %s875_s23, 0 }
  0x3e   : > { %s791_s25 = sand.u32 (!%p880_p12), 1, %s642_s16   ;;  %p881_p1 = scmp.ne.s32.totalorder (!%p880_p12), %s873_s21, 0 }
  0x3f   : > { %193 = sbr.rel (%p880_p12) target bundleno = 588 (0x24c), region = 36  ;;  %s439_s30 = sshll.u32 (!%p880_p12), %s791_s25, 3 }
  0x40   : > { %s196_s5 = scalar_lea.sflag (!%p880_p12), [#allocation3], %s791_s25  ;;  %s199_s6 = scalar_lea.vmem (!%p880_p12), [#allocation2], %s439_s30 }
  0x44   : > { %625 = dma.done.wait (%p881_p1), %s196_s5, 128  }
  0x45   : > { %627 = vsyncadd (%p881_p1), %s196_s5, 4294967168  ;;  %p882_p4 = scmp.eq.s32.totalorder %s705_s19, 0 }
  0x47   : > { %629 = dma.done.wait (%p882_p4), [#allocation6], 512   ;;  %p883_p6 = pmov %p882_p4 }
  0x48   : > { %vm231_vm0 = vcmask 261120   ;;  %v228_v0 = vld [vmem:[%s199_s6] sm:$0xff]  ;;  %v656_v8 = vmov 0.0   ;;  %vm657_vm1 = vmmov 0   ;;  %v261_v10 = vld [vmem:[#allocation5 + $0x8] sm:$0xff]  ;;  %v260_v11 = vld [vmem:[#allocation5] sm:$0xff] }
  0x49   : > { %631 = vsyncadd (%p883_p6), [#allocation6], 4294966784  ;;  %v232_v1 = vsel %vm231_vm0, %v228_v0, 0.0  ;;  %v263_v7 = vld [vmem:[#allocation5 + $0x18] sm:$0xff]  ;;  %454 = vmatprep.subr.mxu0 %v656_v8  ;;  %v262_v9 = vld [vmem:[#allocation5 + $0x10] sm:$0xff]  ;;  %462 = vmatprep.mubr.msk.f32.mxu0 %vm657_vm1, %v656_v8  ;;  %s446_s28 = sshll.u32 %s705_s19, 7 }
  0x4a   : > { %233 = vadd.xlane.f32.xlu0 %v232_v1  ;;  %455 = vmatpush3.msra.mxu0 %v263_v7  ;;  %v442_v16 = vld [vmem:[%s865_s1] ss:$0 sm:$0xff]  ;;  %s227_s29 = scalar_lea.vmem [#allocation7], %s439_s30  ;;  %s820_s13 = scalar_lea.hbm %s868_s4, %s446_s28 }
  0x4b   : > { %456 = vmatprep.subr.mxu0 %v656_v8  ;;  %v443_v18 = vld [vmem:[%s866_s2] ss:$0 sm:$0xff]  ;;  %s352_s7 = sshll.u32 %s227_s29, 4  ;;  %s339_s11 = scalar_lea.sflag [#allocation4], %s791_s25  ;;  %s822_s7 = int_to_ptr.vmem [resolvable:$true] %s352_s7 }
  0x4c   : > { %457 = vmatpush3.msra.mxu0 %v262_v9  ;;  %s582_s14 = scalar_lea.vmem %s822_s7, 128  ;;  %p884_p3 = scmp.ne.s32.totalorder %s878_s10, 0 }
  0x4d   : > { %458 = vmatprep.subr.mxu0 %v656_v8  ;;  %p583_p8 = scmp.ne.s32.totalorder %s822_s7, %s582_s14  ;;  %s658_s19 = smov [#allocation7]  }
  0x4e   : > { %459 = vmatpush3.msra.mxu0 %v261_v10  ;;  %s586_s20 = sshll.u32 %s658_s19, 4  ;;  %s587_s20 = int_to_ptr.vmem [resolvable:$false] %s586_s20 }
  0x4f   : > { %460 = vmatprep.subr.mxu0 %v656_v8  ;;  %p584_p11 = pnand %p583_p8, %p884_p3  ;;  %s588_s30 = scalar_lea.vmem %s587_s20, 256 }
  0x50   : > { %461 = vmatpush3.msra.mxu0 %v260_v11  ;;  %p589_p10 = scmp.lt.s32.totalorder %s822_s7, %s587_s20  ;;  %p590_p2 = scmp.lt.s32.totalorder %s588_s30, %s582_s14 }
  0x51   : > { %p585_p7 = pneg %p584_p11 }
  0x52   : > { %p591_p13 = por %p590_p2, %p589_p10 }
  0x54   : > { %p592_p0 = pnand %p591_p13, %p585_p7 }
  0xd3   : > { %v234_v2 = vpop.xlane.xlu0 %233 }
  0xd4   : > { %v236_v3 = vmul.f32 0.03125, %v234_v2 }
  0xd6   : > { %v237_v4 = vsub.f32 %v228_v0, %v236_v3 }
  0xd8   : > { %v238_v5 = vmul.f32 %v237_v4, %v237_v4 }
  0xda   : > { %v239_v6 = vsel %vm231_vm0, %v238_v5, 0.0 }
  0xdb   : > { %240 = vadd.xlane.f32.xlu0 %v239_v6 }
 0x164   : > { %v241_v12 = vpop.xlane.xlu0 %240 }
 0x165   : > { %v242_v13 = vmul.f32 0.03125, %v241_v12 }
 0x167   : > { %v243_v14 = vadd.f32 1e-05, %v242_v13 }
 0x169   : > { %526 = vrsqrt.f32 %v243_v14 }
 0x176   : > { %v527_v15 = vpop.eup %526 }
 0x177   : > { %v245_v17 = vmul.f32 %v527_v15, %v237_v4 }
 0x179   : > { %v252_v19 = vmul.f32 %v442_v16, %v245_v17 }
 0x17b   : > { %v259_v20 = vadd.f32 %v443_v18, %v252_v19 }
 0x17d   : > { %463 = vmatmul.mubr.msk.f32.vlgmr.msra.gmra.mxu0 %vm231_vm0, %v259_v20 }
 0x23d   : > { %v333_v21 = vpop.f32.mrf.mxu0 }
 0x23e   : > { %337 = vst.msk [vmem:[%s227_s29] sm:$0xff] %vm231_vm0, %v333_v21 }
 0x23f   : > { %v464_v22 = vpop.f32.mrf.mxu0 }
 0x240   : > { %595 = shalt.err (!%p592_p0)
}
 0x241   : > { %s596_s5 = scalar_lea.hbm %s820_s13, 128  ;;  %s600_s21 = scalar_lea.hbm %s868_s4, 256 }
 0x242   : > { %p597_p5 = scmp.ne.s32.totalorder %s820_s13, %s596_s5  ;;  %p601_p1 = scmp.lt.s32.totalorder %s820_s13, %s868_s4 }
 0x243   : > { %p602_p4 = scmp.lt.s32.totalorder %s600_s21, %s596_s5 }
 0x244   : > { %p598_p9 = pnand %p597_p5, %p884_p3 }
 0x245   : > { %p603_p6 = por %p602_p4, %p601_p1 }
 0x246   : > { %p599_p12 = pneg %p598_p9 }
 0x248   : > { %p604_p8 = pnand %p603_p6, %p599_p12 }
 0x24a   : > { %607 = shalt.err (!%p604_p8)
}
 0x24b   : > { %471 = dma.vmem_to_hbm [thread:$0]  (%p884_p3), %s822_s7, 128, %s820_s13, %s339_s11  }
 0x24c PF: > { %s364_s26 = sand.u32 1, %s638_s15   ;;  %p885_p11 = scmp.ne.s32.totalorder %s874_s22, 0 }
 0x24d   : > { %p886_p7 = scmp.ge.s32.totalorder %s650_s18, 2  ;;  %s365_s28 = scalar_lea.sflag [#allocation4], %s364_s26 }
 0x24f   : > { %p482_p10 = pnand %p886_p7, %p885_p11 }
 0x251   : > { %p483_p2 = pneg %p482_p10 }
 0x253   : > { %633 = dma.done.wait (%p483_p2), %s365_s28, 128  }
 0x254   : > { %635 = vsyncadd (%p483_p2), %s365_s28, 4294967168  ;;  %p18_p13 = scmp.ge.s32.totalorder %s738_s27, 4   ;;  %s887_s15 = smov %s642_s16 }
 0x255   : > { %s888_s16 = smov %s646_s17  ;;  %s889_s17 = smov %s755_s9 }
 0x256   : > { %s890_s18 = smov %s738_s27  ;;  %20 = sbr.rel (!%p18_p13) target bundleno = 6 (0x6), region = 85 }
 0x25b   :  { %370 = vsyncpa [#allocation3], 1 }
 0x25c   :  { %372 = vsyncpa [#allocation3 + $0x1], 1 }
 0x25d   :  { %373 = vsyncpa [#allocation6], 1 }
 0x25e   :  { %374 = vsyncpa [#allocation4], 1 }
 0x25f   :  { %376 = vsyncpa [#allocation4 + $0x1], 1 }

</bundles_post_ra>
